<compile_context>
chip_gen: v7x
topology: tpu7x:2x2x1
jax: 0.10.0
libtpu: 0.0.40
codegen_flags: <defaults>
</compile_context>

<pallas_src>
import jax
import jax.numpy as jnp
from jax.experimental import pallas as pl
from jax.experimental.pallas import tpu as pltpu


_LANE = 128
_MAX_TILE = 65536          # hard cap on the pixel-tile width (lanes)
_MAX_BATCH_BLOCK = 16      # hard cap on batch elements folded into one grid step


def _hw_params():
    """Generation-aware sizing: (#TensorCores/chip, vmem cap, per-step byte budget)."""
    kind = ""
    try:
        kind = jax.devices()[0].device_kind.lower()
    except Exception:
        pass
    if "7" in kind:
        # v7x: 2 TensorCores / chip, 64 MiB VMEM per core.
        return 2, 40 * 1024 * 1024, 8 * 1024 * 1024
    # v5e / v6e: 1 TensorCore / chip, 128 MiB VMEM.
    return 1, 96 * 1024 * 1024, 16 * 1024 * 1024


def _pick_tile(hw, c, itemsize, budget, requested):
    """Pixel-tile width (lane dim): biggest 128-multiple within the byte budget."""
    if requested is not None:
        tm = int(requested)
    else:
        tm = budget // ((c + 3) * itemsize)
        tm = max(_LANE, min(tm, _MAX_TILE))
    if tm >= hw:
        return hw                              # single tile: full dim is always legal
    return max(_LANE, (tm // _LANE) * _LANE)   # otherwise keep a multiple of 128


def _pick_batch_block(b, hw, c, itemsize, budget, tm):
    """Fold several batch elements into one grid step when the image is small."""
    if tm < hw or b == 1:
        return 1
    per_batch = max(1, (c + 3) * hw * itemsize)
    max_nb = min(_MAX_BATCH_BLOCK, max(1, budget // per_batch))
    nb = 1
    for d in range(1, b + 1):
        if b % d == 0 and d <= max_nb:
            nb = d
    return nb


def spectral_loss(output, rgb, srf, *, tm=None, num_splits=None):
    """output: (B, C, H, W), rgb: (B, 3, H, W), srf: (3, C). Returns scalar f32."""
    B, C, H, W = output.shape
    assert rgb.shape == (B, 3, H, W), rgb.shape
    assert srf.shape == (3, C), srf.shape
    HW = H * W

    num_cores, vmem_cap, budget = _hw_params()
    itemsize = jnp.dtype(output.dtype).itemsize

    # Free, contiguous reshapes — no NCHW->NHWC transpose pass over HBM.
    x = output.reshape(B, C, HW)               # bands on sublanes, pixels on lanes
    r = rgb.reshape(B, 3, HW)
    srf_c = srf.astype(output.dtype)           # pre-cast once; native-dtype MXU path

    tm_ = _pick_tile(HW, C, itemsize, budget, tm)
    nb = _pick_batch_block(B, HW, C, itemsize, budget, tm_)
    ntiles = -(-HW // tm_)
    nbsteps = B // nb

    if num_splits is None:
        num_splits = 2 if (num_cores > 1 and ntiles >= 2) else 1
    num_splits = max(1, int(num_splits))
    tiles_per_split = -(-ntiles // num_splits)

    remainder = HW % tm_
    overhang = num_splits * tiles_per_split > ntiles
    has_ragged = (remainder != 0) or overhang
    first_ragged = ntiles - 1 if remainder != 0 else ntiles

    def data_map(s, b, i):
        g = s * tiles_per_split + i
        # Clamp the split-overhang tile to a valid block; its contribution is
        # masked to zero inside the kernel.
        return (b, 0, jnp.minimum(g, ntiles - 1))

    def kernel(x_ref, srf_ref, rgb_ref, out_ref, acc_ref):
        s = pl.program_id(0)       # pixel-range split (one per TensorCore on v7x)
        b = pl.program_id(1)       # batch block
        i = pl.program_id(2)       # pixel tile within split

        @pl.when((b == 0) & (i == 0))
        def _init():
            acc_ref[...] = jnp.zeros_like(acc_ref)

        wf = srf_ref[...]          # (3, C), native compute dtype (no per-step cast)

        # Band -> RGB projection + squared error for each batch element in the
        # block; nb is a small static constant (unrolled at trace time).
        sq_sum = None
        for bl in range(nb):
            rgb_re = jnp.dot(wf, x_ref[bl],
                             preferred_element_type=jnp.float32)    # (3, tm_) f32
            diff = rgb_re - rgb_ref[bl].astype(jnp.float32)
            contrib = diff * diff
            sq_sum = contrib if sq_sum is None else sq_sum + contrib

        if has_ragged:
            g = s * tiles_per_split + i

            @pl.when(g < first_ragged)
            def _interior():                   # full tiles: plain accumulate, no mask
                acc_ref[...] += sq_sum

            @pl.when(g >= first_ragged)
            def _edge():                       # remainder / clamped overhang tile
                lane = jax.lax.broadcasted_iota(jnp.int32, (3, tm_), 1)
                valid = (g * tm_ + lane) < HW
                acc_ref[...] += jnp.where(valid, sq_sum, jnp.float32(0.0))
        else:
            acc_ref[...] += sq_sum

        @pl.when((b == pl.num_programs(1) - 1) & (i == pl.num_programs(2) - 1))
        def _finalize():                       # one cross-lane reduce per split
            part = jnp.sum(acc_ref[...], axis=1, keepdims=True)     # (3, 1)
            out_ref[...] = jnp.sum(part, axis=0, keepdims=True)     # (1, 1)

    # VMEM need: double-buffered inputs + f32 accumulator + srf + slack,
    # clamped to the generation cap (<= 40 MiB on v7x, <= 96 MiB on v5e/v6e).
    step_bytes = (C + 3) * nb * tm_ * itemsize
    needed = 2 * step_bytes + 3 * tm_ * 4 + 3 * C * itemsize + (1 << 20)
    vmem_limit = int(min(vmem_cap, max(32 * 1024 * 1024, 2 * needed)))

    cost = pl.CostEstimate(
        flops=int(2 * 3 * C * HW * B + 3 * 3 * HW * B),
        transcendentals=0,
        bytes_accessed=int(x.size * itemsize
                           + r.size * jnp.dtype(r.dtype).itemsize
                           + srf_c.size * itemsize + num_splits * 4),
    )

    def build(core_parallel):
        sem0 = pltpu.CORE_PARALLEL if core_parallel else pltpu.ARBITRARY
        return pl.pallas_call(
            kernel,
            out_shape=jax.ShapeDtypeStruct((num_splits, 1, 1), jnp.float32),
            grid_spec=pltpu.PrefetchScalarGridSpec(
                num_scalar_prefetch=0,
                grid=(num_splits, nbsteps, tiles_per_split),
                in_specs=[
                    pl.BlockSpec((nb, C, tm_), data_map),            # hyperspectral bands
                    pl.BlockSpec((3, C), lambda s, b, i: (0, 0)),    # srf (resident)
                    pl.BlockSpec((nb, 3, tm_), data_map),            # target rgb
                ],
                out_specs=pl.BlockSpec((None, 1, 1), lambda s, b, i: (s, 0, 0)),
                scratch_shapes=[pltpu.VMEM((3, tm_), jnp.float32)],
            ),
            compiler_params=pltpu.CompilerParams(
                dimension_semantics=(sem0, pltpu.ARBITRARY, pltpu.ARBITRARY),
                vmem_limit_bytes=vmem_limit,
            ),
            cost_estimate=cost,
        )

    if num_cores > 1 and num_splits > 1:
        # CORE_PARALLEL guarantees one split per TensorCore on v7x; fall back to
        # a serial (still correct) schedule if this compiler build rejects it.
        try:
            partials = build(True)(x, srf_c, r)
        except Exception:
            partials = build(False)(x, srf_c, r)
    else:
        partials = build(False)(x, srf_c, r)

    inv_count = 1.0 / (float(B) * 3.0 * float(HW))   # exact reciprocal in f64
    return jnp.sum(partials) * inv_count


if __name__ == "__main__":
    key = jax.random.PRNGKey(0)

    def ref_loss(output, rgb, srf):
        rgb_re = jnp.einsum("bchw,rc->brhw",
                            output.astype(jnp.float32), srf.astype(jnp.float32))
        return jnp.mean((rgb_re - rgb.astype(jnp.float32)) ** 2)

    def check(B, C, H, W, tm=None, num_splits=None):
        k = jax.random.fold_in(key, B * 10000 + C * 100 + H + W)
        k1, k2, k3 = jax.random.split(k, 3)
        output = jax.random.normal(k1, (B, C, H, W), dtype=jnp.float32)
        rgb = jax.random.normal(k2, (B, 3, H, W), dtype=jnp.float32)
        srf = jax.random.uniform(k3, (3, C), dtype=jnp.float32)
        got = jax.block_until_ready(
            spectral_loss(output, rgb, srf, tm=tm, num_splits=num_splits))
        want = ref_loss(output, rgb, srf)
        assert jnp.allclose(got, want, rtol=1e-5, atol=1e-6), (B, C, H, W, tm, got, want)

    # primary small case: single pixel tile, batch-blocked (nb=2) grid step
    check(2, 8, 16, 16)
    # multi-tile + forced 2-way split with an odd tile count (clamped overhang tile)
    check(2, 8, 16, 24, tm=128, num_splits=2)
    # remainder-masking path: HW=400 -> last 128-wide tile has only 16 valid pixels
    check(1, 8, 20, 20, tm=128)

    print("KERNEL_OK")
</pallas_src>

<mosaic_0001>
module attributes {stable_mosaic.version = 11 : i64} {
  func.func @kernel(%arg0: i32, %arg1: i32, %arg2: i32, %arg3: memref<2x8x256xf32, #tpu.memory_space<vmem>>, %arg4: memref<3x8xf32, #tpu.memory_space<vmem>>, %arg5: memref<2x3x256xf32, #tpu.memory_space<vmem>>, %arg6: memref<1x1x1xf32, #tpu.memory_space<vmem>>, %arg7: memref<3x256xf32, #tpu.memory_space<vmem>>) attributes {dimension_semantics = [#tpu.dimension_semantics<arbitrary>, #tpu.dimension_semantics<arbitrary>, #tpu.dimension_semantics<arbitrary>], iteration_bounds = array<i64: 1, 1, 1>, scalar_prefetch = 0 : i64, scratch_operands = 1 : i64, tpu.core_type = #tpu.core_type<tc>, window_params = [{transform_indices = @transform_0, window_bounds = array<i64: 2, 8, 256>}, {pipeline_mode = #tpu.pipeline_mode<synchronous>, transform_indices = @transform_1, window_bounds = array<i64: 3, 8>}, {transform_indices = @transform_2, window_bounds = array<i64: 2, 3, 256>}, {transform_indices = @transform_3, window_bounds = array<i64: 1, 1, 1>}]} {
    %c0_i32 = arith.constant 0 : i32
    %0 = arith.cmpi eq, %arg1, %c0_i32 : i32
    %c0_i32_0 = arith.constant 0 : i32
    %1 = arith.cmpi eq, %arg2, %c0_i32_0 : i32
    %2 = arith.andi %0, %1 : i1
    %3 = arith.extui %2 : i1 to i32
    %c0_i32_1 = arith.constant 0 : i32
    %4 = arith.cmpi ne, %3, %c0_i32_1 : i32
    scf.if %4 {
      %cst_22 = arith.constant 0.000000e+00 : f32
      %29 = vector.broadcast %cst_22 : f32 to vector<3x256xf32>
      %c0_23 = arith.constant 0 : index
      %c0_24 = arith.constant 0 : index
      %30 = vector.load %arg7[%c0_23, %c0_24] : memref<3x256xf32, #tpu.memory_space<vmem>>, vector<3x256xf32>
      tpu.vector_store %arg7[%c0_23, %c0_24], %29 {strides = array<i32>} : memref<3x256xf32, #tpu.memory_space<vmem>>, vector<3x256xf32>,
    } else {
    }
    %c0 = arith.constant 0 : index
    %c0_2 = arith.constant 0 : index
    %5 = vector.load %arg4[%c0, %c0_2] : memref<3x8xf32, #tpu.memory_space<vmem>>, vector<3x8xf32>
    %c0_3 = arith.constant 0 : index
    %c0_4 = arith.constant 0 : index
    %c0_5 = arith.constant 0 : index
    %6 = vector.load %arg3[%c0_3, %c0_4, %c0_5] : memref<2x8x256xf32, #tpu.memory_space<vmem>>, vector<1x8x256xf32>
    %7 = vector.shape_cast %6 : vector<1x8x256xf32> to vector<8x256xf32>
    %cst = arith.constant dense<0.000000e+00> : vector<3x256xf32>
    %8 = tpu.matmul %5, %7, %cst {dimension_numbers = #tpu.dot_dimension_numbers<[1], [0], [0], [1], [0, 0, 1, 1], [], []>} : vector<3x8xf32>, vector<8x256xf32>, vector<3x256xf32> -> vector<3x256xf32>
    %c0_6 = arith.constant 0 : index
    %c0_7 = arith.constant 0 : index
    %c0_8 = arith.constant 0 : index
    %9 = vector.load %arg5[%c0_6, %c0_7, %c0_8] : memref<2x3x256xf32, #tpu.memory_space<vmem>>, vector<1x3x256xf32>
    %10 = vector.shape_cast %9 : vector<1x3x256xf32> to vector<3x256xf32>
    %11 = arith.subf %8, %10 : vector<3x256xf32>
    %12 = arith.mulf %11, %11 : vector<3x256xf32>
    %c1 = arith.constant 1 : index
    %c0_9 = arith.constant 0 : index
    %c0_10 = arith.constant 0 : index
    %13 = vector.load %arg3[%c1, %c0_9, %c0_10] : memref<2x8x256xf32, #tpu.memory_space<vmem>>, vector<1x8x256xf32>
    %14 = vector.shape_cast %13 : vector<1x8x256xf32> to vector<8x256xf32>
    %cst_11 = arith.constant dense<0.000000e+00> : vector<3x256xf32>
    %15 = tpu.matmul %5, %14, %cst_11 {dimension_numbers = #tpu.dot_dimension_numbers<[1], [0], [0], [1], [0, 0, 1, 1], [], []>} : vector<3x8xf32>, vector<8x256xf32>, vector<3x256xf32> -> vector<3x256xf32>
    %c1_12 = arith.constant 1 : index
    %c0_13 = arith.constant 0 : index
    %c0_14 = arith.constant 0 : index
    %16 = vector.load %arg5[%c1_12, %c0_13, %c0_14] : memref<2x3x256xf32, #tpu.memory_space<vmem>>, vector<1x3x256xf32>
    %17 = vector.shape_cast %16 : vector<1x3x256xf32> to vector<3x256xf32>
    %18 = arith.subf %15, %17 : vector<3x256xf32>
    %19 = arith.mulf %18, %18 : vector<3x256xf32>
    %20 = arith.addf %12, %19 : vector<3x256xf32>
    %c0_15 = arith.constant 0 : index
    %c0_16 = arith.constant 0 : index
    %21 = vector.load %arg7[%c0_15, %c0_16] : memref<3x256xf32, #tpu.memory_space<vmem>>, vector<3x256xf32>
    %22 = arith.addf %21, %20 : vector<3x256xf32>
    %c0_17 = arith.constant 0 : index
    %c0_18 = arith.constant 0 : index
    %23 = vector.load %arg7[%c0_17, %c0_18] : memref<3x256xf32, #tpu.memory_space<vmem>>, vector<3x256xf32>
    tpu.vector_store %arg7[%c0_17, %c0_18], %22 {strides = array<i32>} : memref<3x256xf32, #tpu.memory_space<vmem>>, vector<3x256xf32>,
    %c0_i32_19 = arith.constant 0 : i32
    %24 = arith.cmpi eq, %arg1, %c0_i32_19 : i32
    %c0_i32_20 = arith.constant 0 : i32
    %25 = arith.cmpi eq, %arg2, %c0_i32_20 : i32
    %26 = arith.andi %24, %25 : i1
    %27 = arith.extui %26 : i1 to i32
    %c0_i32_21 = arith.constant 0 : i32
    %28 = arith.cmpi ne, %27, %c0_i32_21 : i32
    scf.if %28 {
      %c0_22 = arith.constant 0 : index
      %c0_23 = arith.constant 0 : index
      %29 = vector.load %arg7[%c0_22, %c0_23] : memref<3x256xf32, #tpu.memory_space<vmem>>, vector<3x256xf32>
      %cst_24 = arith.constant dense<0.000000e+00> : vector<3xf32>
      %30 = vector.multi_reduction <add>, %29, %cst_24 [1] : vector<3x256xf32> to vector<3xf32>
      %31 = vector.shape_cast %30 : vector<3xf32> to vector<3x1xf32>
      %cst_25 = arith.constant dense<0.000000e+00> : vector<1xf32>
      %32 = vector.multi_reduction <add>, %31, %cst_25 [0] : vector<3x1xf32> to vector<1xf32>
      %33 = vector.shape_cast %32 : vector<1xf32> to vector<1x1xf32>
      %c0_26 = arith.constant 0 : index
      %c0_27 = arith.constant 0 : index
      %c0_28 = arith.constant 0 : index
      %34 = vector.load %arg6[%c0_26, %c0_27, %c0_28] : memref<1x1x1xf32, #tpu.memory_space<vmem>>, vector<1x1x1xf32>
      %35 = vector.shape_cast %34 : vector<1x1x1xf32> to vector<1x1xf32>
      %36 = vector.shape_cast %33 : vector<1x1xf32> to vector<1x1x1xf32>
      tpu.vector_store %arg6[%c0_26, %c0_27, %c0_28], %36 {strides = array<i32>} : memref<1x1x1xf32, #tpu.memory_space<vmem>>, vector<1x1x1xf32>,
    } else {
    }
    return
  }
  func.func @transform_0(%arg0: i32, %arg1: i32, %arg2: i32) -> (i32, i32, i32) {
    %c1_i32 = arith.constant 1 : i32
    %0 = arith.muli %arg0, %c1_i32 : i32
    %1 = arith.addi %0, %arg2 : i32
    %c0_i32 = arith.constant 0 : i32
    %2 = arith.minsi %1, %c0_i32 : i32
    %c0_i32_0 = arith.constant 0 : i32
    %c0_i32_1 = arith.constant 0 : i32
    return %arg1, %c0_i32_0, %2 : i32, i32, i32
  }
  func.func @transform_1(%arg0: i32, %arg1: i32, %arg2: i32) -> (i32, i32) {
    %c0_i32 = arith.constant 0 : i32
    %c0_i32_0 = arith.constant 0 : i32
    %c0_i32_1 = arith.constant 0 : i32
    return %c0_i32, %c0_i32_0 : i32, i32
  }
  func.func @transform_2(%arg0: i32, %arg1: i32, %arg2: i32) -> (i32, i32, i32) {
    %c1_i32 = arith.constant 1 : i32
    %0 = arith.muli %arg0, %c1_i32 : i32
    %1 = arith.addi %0, %arg2 : i32
    %c0_i32 = arith.constant 0 : i32
    %2 = arith.minsi %1, %c0_i32 : i32
    %c0_i32_0 = arith.constant 0 : i32
    %c0_i32_1 = arith.constant 0 : i32
    return %arg1, %c0_i32_0, %2 : i32, i32, i32
  }
  func.func @transform_3(%arg0: i32, %arg1: i32, %arg2: i32) -> (i32, i32, i32) {
    %c0_i32 = arith.constant 0 : i32
    %c0_i32_0 = arith.constant 0 : i32
    %c0_i32_1 = arith.constant 0 : i32
    return %arg0, %c0_i32, %c0_i32_0 : i32, i32, i32
  }
}

</mosaic_0001>

<bundles_post_ra>
// kernel: tpu_custom_call.1
= control target key start
LH: loop header
LB: loop body
LE: loop exit
PB: predicated region body
PF: predicated region fallthrough
CT: control target
= control target key end

     0   :  { %8 = vsyncpa [#allocation4], 0  ;;  %s417_s0 = inlined_call_operand.hbm [shape: f32[2,8,256], index: 0, kind: input, shape index: {}]   ;;  %s418_s1 = inlined_call_operand.vmem [shape: f32[3,8], index: 1, kind: input, shape index: {}]   ;;  %s419_s2 = inlined_call_operand.vmem [shape: f32[2,3,256], index: 2, kind: input, shape index: {}]   ;;  %s420_s3 = inlined_call_operand.hbm [shape: f32[1,1,1], index: 3, kind: output, shape index: {}]  }
   0x1   :  { %9 = vsyncpa [#allocation5], 0  ;;  %s359_s12 = smov [#allocation3]   ;;  %s311_s16 = scalar_lea.hbm %s417_s0, 512 }
   0x2   :  { %s21_s13 = sshll.u32 %s359_s12, 4  ;;  %p312_p0 = scmp.ne.s32.totalorder %s417_s0, %s311_s16  ;;  %s22_s13 = int_to_ptr.vmem [resolvable:$true] %s21_s13 }
   0x3   :  { %p315_p1 = scmp.lt.u32.totalorder %s311_s16, %s417_s0 }
   0x5   :  { %p317_p2 = pnand %p315_p1, %p312_p0 }
   0x7   :  { %320 = shalt.err (!%p317_p2)
}
   0x8   :  { %s321_s21 = scalar_lea.vmem %s22_s13, 512  ;;  %p326_p4 = scmp.lt.s32.totalorder %s22_s13, %s22_s13 }
   0x9   :  { %p322_p3 = scmp.ne.s32.totalorder %s22_s13, %s321_s21  ;;  %p327_p5 = scmp.lt.s32.totalorder %s321_s21, %s321_s21 }
   0xb   :  { %p328_p6 = por %p327_p5, %p326_p4 }
   0xd   :  { %p329_p7 = pnand %p328_p6, %p322_p3 }
   0xf   :  { %332 = shalt.err (!%p329_p7)
}
  0x10   :  { %s360_s22 = smov 256   ;;  %s361_s23 = smov 16  }
  0x11   :  { %27 = dma.hbm_to_vmem [thread:$0]  %s417_s0, 512, %s22_s13, [#allocation4], %s360_s22, %s360_s22, %s361_s23  }
  0x12   :  { %355 = dma.done.wait [#allocation4], 512  }
  0x13   :  { %356 = vsyncadd [#allocation4], 4294966784  ;;  %v362_v0 = vmov 0.0   ;;  %v80_v1 = vld [vmem:[#allocation3 + $0x8] sm:$0xff]  ;;  %v166_v2 = vld [vmem:[#allocation3 + $0x18] sm:$0xff]  ;;  %vm81_vm0 = vcmask 64512  }
  0x14   :  { %77 = vst [vmem:[#allocation2] sm:$0x77] %v362_v0  ;;  %149 = vmatprep.mubr.f32.mxu0 %v362_v0  ;;  %231 = vmatprep.mubr.f32.mxu1 %v362_v0  ;;  %v79_v3 = vld [vmem:[#allocation3] sm:$0xff]  ;;  %v165_v4 = vld [vmem:[#allocation3 + $0x10] sm:$0xff]  ;;  %v78_v5 = vld [vmem:[%s418_s1] sm:$0x7] }
  0x15   :  { %85 = vmatprep.subr.mxu0 %v80_v1  ;;  %167 = vmatprep.subr.mxu1 %v166_v2  ;;  %v156_v6 = vld [vmem:[%s419_s2] sm:$0x77]  ;;  %v302_v7 = vld [vmem:[%s419_s2 + $0x8] sm:$0x77]  ;;  %vm262_vm1 = vcmask 1042432   ;;  %s363_s1 = smov [#allocation6]  }
  0x16   :  { %86 = vmatpush1.msra.mxu0 %v79_v3  ;;  %168 = vmatpush1.msra.mxu1 %v165_v4  ;;  %v158_v8 = vcombine.high %v156_v6, %v156_v6  ;;  %v241_v9 = vcombine.high %v302_v7, %v302_v7  ;;  %s283_s2 = sshll.u32 %s363_s1, 4  ;;  %vm275_vm2 = vcmask 0   ;;  %s284_s2 = int_to_ptr.vmem [resolvable:$true] %s283_s2 }
  0x17   :  { %300 = vmatmul.mubr.msk.f32.vlgmr.msra.gmra.mrb[0].mxu0 %vm81_vm0, %v78_v5  ;;  %301 = vmatmul.mubr.msk.f32.vlgmr.msra.gmra.mrb[0].mxu1 %vm81_vm0, %v78_v5  ;;  %s333_s4 = scalar_lea.vmem %s284_s2, 16  ;;  %s337_s5 = scalar_lea.vmem %s284_s2, 32 }
  0x18   :  { %p334_p8 = scmp.ne.s32.totalorder %s284_s2, %s333_s4  ;;  %p338_p9 = scmp.lt.s32.totalorder %s284_s2, %s284_s2 }
  0x19   :  { %p339_p10 = scmp.lt.s32.totalorder %s337_s5, %s333_s4 }
  0x1b   :  { %v249_v24 = vld [vmem:[#allocation2] sm:$0x77]  ;;  %p340_p11 = por %p339_p10, %p338_p9 }
  0x1d   :  { %p341_p12 = pnand %p340_p11, %p334_p8 }
  0xea   :  { %v151_v10 = vpop.f32.mrb[0].mxu0  ;;  %v233_v11 = vpop.f32.mrb[0].mxu1 }
  0xeb   :  { %v160_v12 = vsub.f32 %v151_v10, %v156_v6  ;;  %v243_v13 = vsub.f32 %v233_v11, %v302_v7  ;;  %v153_v14 = vpop.f32.mrb[1].mxu0  ;;  %v235_v15 = vpop.f32.mrb[1].mxu1 }
  0xec   :  { %v161_v16 = vsub.f32 %v153_v14, %v158_v8  ;;  %v244_v17 = vsub.f32 %v235_v15, %v241_v9 }
  0xed   :  { %v162_v18 = vmul.f32 %v160_v12, %v160_v12  ;;  %v245_v19 = vmul.f32 %v243_v13, %v243_v13 }
  0xee   :  { %v163_v20 = vmul.f32 %v161_v16, %v161_v16  ;;  %v246_v21 = vmul.f32 %v244_v17, %v244_v17 }
  0xef   :  { %v247_v22 = vadd.f32 %v245_v19, %v162_v18 }
  0xf0   :  { %v248_v23 = vadd.f32 %v246_v21, %v163_v20 }
  0xf2   :  { %v252_v25 = vcombine.low %v247_v22, %v248_v23 }
  0xf4   :  { %v254_v26 = vadd.f32 %v252_v25, %v249_v24 }
  0xf6   :  { %255 = vst [vmem:[#allocation2] sm:$0x77] %v254_v26 }
  0xfd   :  { %v258_v27 = vld [vmem:[#allocation2] sm:$0x77] }
  0xfe   :  { %v260_v28 = vcombine.high %v258_v27, %v258_v27  ;;  %v263_v29 = vsel %vm262_vm1, %v258_v27, 0.0 }
 0x100   :  { %v264_v30 = vsel %vm262_vm1, %v260_v28, 0.0 }
 0x101   :  { %v265_v31 = vadd.f32 %v264_v30, %v263_v29 }
 0x103   :  { %266 = vadd.xlane.f32.xlu0 %v265_v31 }
 0x190   :  { %v267_v32 = vpop.xlane.xlu0 %266 }
 0x191   :  { %v268_v33 = vsel %vm262_vm1, %v267_v32, 0.0 }
 0x192   :  { %v269_v34 = vrot.slane %v268_v33, 4 }
 0x194   :  { %v270_v35 = vadd.f32 %v269_v34, %v268_v33 }
 0x196   :  { %v271_v36 = vrot.slane %v270_v35, 2 }
 0x198   :  { %v272_v37 = vadd.f32 %v271_v36, %v270_v35 }
 0x19a   :  { %v273_v38 = vrot.slane %v272_v37, 1 }
 0x19c   :  { %v274_v39 = vadd.f32 %v273_v38, %v272_v37 }
 0x19e   :  { %276 = vst.msk [vmem:[#allocation6] sm:$0x1] %vm275_vm2, %v274_v39 }
 0x19f   :  { %344 = shalt.err (!%p341_p12)
}
 0x1a0   :  { %s345_s8 = scalar_lea.hbm %s420_s3, 16 }
 0x1a1   :  { %p346_p13 = scmp.ne.s32.totalorder %s420_s3, %s345_s8  ;;  %p349_p0 = scmp.lt.u32.totalorder %s345_s8, %s420_s3 }
 0x1a3   :  { %p351_p1 = pnand %p349_p0, %p346_p13 }
 0x1a5   :  { %354 = shalt.err (!%p351_p1)
}
 0x1a6   :  { %286 = dma.vmem_to_hbm [thread:$0]  %s284_s2, 16, %s420_s3, [#allocation5]  }
 0x1a7   :  { %357 = dma.done.wait [#allocation5], 16  }
 0x1a8   :  { %358 = vsyncadd [#allocation5], 4294967280 }
 0x1a9   :  { %290 = vsyncpa [#allocation4], 1 }
 0x1aa   :  { %291 = vsyncpa [#allocation5], 1 }

</bundles_post_ra>
